<compile_context>
chip_gen: v7x
topology: tpu7x:2x2x1
jax: 0.10.0
libtpu: 0.0.40
codegen_flags: <defaults>
</compile_context>

<pallas_src>
import functools

import jax
import jax.numpy as jnp
from jax.experimental import pallas as pl
from jax.experimental.pallas import tpu as pltpu


NEG_SLOPE = 0.01  # PyTorch nn.LeakyReLU default negative_slope
LANE = 128        # TPU lane width


def _round_up(x, m):
    return ((x + m - 1) // m) * m


def _leaky_relu(x):
    return jnp.where(x > 0, x, NEG_SLOPE * x)


def mu_kernel(s_ref, w1_ref, b1_ref, w2_ref, b2_ref, w3_ref, b3_ref, o_ref):
    """Fused 3-layer MLP (Linear->LeakyReLU x2, Linear->Tanh) on one batch tile.

    All weight matrices live entirely in VMEM (constant block index), so only
    the batch dimension is tiled.  Matmul inputs are bf16 (MXU-native) with
    f32 accumulation; activations/bias-adds are done in f32.
    """
    x = s_ref[...].astype(jnp.bfloat16)

    # Layer 1: Linear(s_i_dim -> hidden) + LeakyReLU
    h = jnp.dot(x, w1_ref[...], preferred_element_type=jnp.float32)
    h = _leaky_relu(h + b1_ref[...].astype(jnp.float32))

    # Layer 2: Linear(hidden -> hidden // 2) + LeakyReLU
    h = jnp.dot(h.astype(jnp.bfloat16), w2_ref[...],
                preferred_element_type=jnp.float32)
    h = _leaky_relu(h + b2_ref[...].astype(jnp.float32))

    # Layer 3: Linear(hidden // 2 -> a_pad) + Tanh  (a_pad is lane-dense: 128)
    h = jnp.dot(h.astype(jnp.bfloat16), w3_ref[...],
                preferred_element_type=jnp.float32)
    h = jnp.tanh(h + b3_ref[...].astype(jnp.float32))

    o_ref[...] = h.astype(o_ref.dtype)


@functools.partial(jax.jit, static_argnames=("block_b",))
def mu_forward(s, params, *, block_b=None):
    """Apply the Mu MLP to a batch of states via a single pallas_call.

    `params` = (W1, b1, W2, b2, W3, b3) with Wk of shape (in, out) and bk of
    shape (1, out), typically bf16.  Returns (batch, a_i_dim) in s.dtype.
    """
    w1, b1, w2, b2, w3, b3 = params
    B, s_dim = s.shape
    hidden = w1.shape[1]
    half = w2.shape[1]
    a_dim = w3.shape[1]

    # ---- Batch tile selection (amortize per-step overhead; >=2 steps when
    # the batch is large so v7x's two TensorCores both get work). ----
    if block_b is None:
        n_tiles = max(1, pl.cdiv(B, 1024))
        block_b = _round_up(pl.cdiv(B, n_tiles), 8)
    block_b = max(8, _round_up(block_b, 8))
    B_pad = _round_up(B, block_b)
    if B_pad != B:
        s = jnp.pad(s, ((0, B_pad - B), (0, 0)))

    # ---- Lane-dense output: zero-pad layer-3 to 128 output columns so the
    # kernel issues full-lane (unmasked) stores.  Padded bias columns stay 0
    # so the sliced result is unchanged. ----
    a_pad = _round_up(a_dim, LANE)
    if a_pad != a_dim:
        w3 = jnp.pad(w3, ((0, 0), (0, a_pad - a_dim)))
        b3 = jnp.pad(b3, ((0, 0), (0, a_pad - a_dim)))

    grid = (B_pad // block_b,)

    # Constant-index full blocks for parameters: they are DMA'd into VMEM once
    # and stay resident across all grid steps.  Do not tile these.
    full = lambda shape: pl.BlockSpec(shape, lambda i: (0, 0))

    param_bytes = sum(int(p.size) * p.dtype.itemsize
                      for p in (w1, b1, w2, b2, w3, b3))
    cost = pl.CostEstimate(
        flops=2 * B_pad * (s_dim * hidden + hidden * half + half * a_pad),
        transcendentals=B_pad * a_pad,  # tanh
        bytes_accessed=B_pad * s_dim * s.dtype.itemsize
        + B_pad * a_pad * s.dtype.itemsize
        + param_bytes,
    )

    out = pl.pallas_call(
        mu_kernel,
        out_shape=jax.ShapeDtypeStruct((B_pad, a_pad), s.dtype),
        grid=grid,
        in_specs=[
            pl.BlockSpec((block_b, s_dim), lambda i: (i, 0)),   # s tile
            full((s_dim, hidden)),                              # W1
            full((1, hidden)),                                  # b1
            full((hidden, half)),                               # W2
            full((1, half)),                                    # b2
            full((half, a_pad)),                                # W3 (padded)
            full((1, a_pad)),                                   # b3 (padded)
        ],
        out_specs=pl.BlockSpec((block_b, a_pad), lambda i: (i, 0)),
        compiler_params=pltpu.CompilerParams(
            dimension_semantics=("parallel",)),
        cost_estimate=cost,
    )(s, w1, b1, w2, b2, w3, b3)

    # Slice away batch padding and the lane-padding of the output.
    return out[:B, :a_dim]


def init_mu_params(key, s_i_dim, a_i_dim, hidden_size_mu,
                   dtype=jnp.bfloat16):
    """Deterministic init mimicking PyTorch nn.Linear defaults
    (uniform(-1/sqrt(fan_in), 1/sqrt(fan_in)) for weights and biases).
    Weights are returned already transposed to (in, out), stored in `dtype`
    (bf16 by default: MXU-native, halves parameter DMA)."""
    dims = [(s_i_dim, hidden_size_mu),
            (hidden_size_mu, hidden_size_mu // 2),
            (hidden_size_mu // 2, a_i_dim)]
    params = []
    for (fan_in, fan_out) in dims:
        key, kw, kb = jax.random.split(key, 3)
        bound = 1.0 / jnp.sqrt(jnp.asarray(fan_in, dtype=jnp.float32))
        w = jax.random.uniform(kw, (fan_in, fan_out), dtype=jnp.float32,
                               minval=-bound, maxval=bound)
        b = jax.random.uniform(kb, (1, fan_out), dtype=jnp.float32,
                               minval=-bound, maxval=bound)
        params += [w.astype(dtype), b.astype(dtype)]
    return tuple(params)


def mu_reference(s, params):
    """Pure-JAX f32 reference of the PyTorch forward pass (params upcast)."""
    w1, b1, w2, b2, w3, b3 = [p.astype(jnp.float32) for p in params]
    s = s.astype(jnp.float32)
    h = _leaky_relu(s @ w1 + b1)
    h = _leaky_relu(h @ w2 + b2)
    return jnp.tanh(h @ w3 + b3)


# TODO(synk): if MADDPG runs one Mu per agent, fuse agents into a single call
# (stack weights as (n_agents, in, out) and add an agent grid axis) instead of
# launching one tiny pallas_call per agent.


if __name__ == "__main__":
    # Small shapes consistent with the module: per-agent state dim 16,
    # action dim 4, hidden size 32 (-> 32 // 2 = 16), batch 8.
    S_I_DIM, A_I_DIM, HIDDEN = 16, 4, 32
    BATCH = 8

    key = jax.random.PRNGKey(0)
    k_params, k_state = jax.random.split(key)

    params = init_mu_params(k_params, S_I_DIM, A_I_DIM, HIDDEN,
                            dtype=jnp.bfloat16)
    s = jax.random.normal(k_state, (BATCH, S_I_DIM), dtype=jnp.float32)

    out = mu_forward(s, params)
    out = jax.block_until_ready(out)

    ref = mu_reference(s, params)
    assert out.shape == (BATCH, A_I_DIM), out.shape
    # bf16 matmul inputs with f32 accumulation -> loosened tolerance.
    assert jnp.allclose(out, ref, atol=2e-2, rtol=2e-2), \
        float(jnp.max(jnp.abs(out - ref)))

    print("KERNEL_OK")
</pallas_src>

<mosaic_0001>
module attributes {stable_mosaic.version = 11 : i64} {
  func.func @mu_kernel(%arg0: i32, %arg1: memref<8x16xf32, #tpu.memory_space<vmem>>, %arg2: memref<16x32xbf16, #tpu.memory_space<vmem>>, %arg3: memref<1x32xbf16, #tpu.memory_space<vmem>>, %arg4: memref<32x16xbf16, #tpu.memory_space<vmem>>, %arg5: memref<1x16xbf16, #tpu.memory_space<vmem>>, %arg6: memref<16x128xbf16, #tpu.memory_space<vmem>>, %arg7: memref<1x128xbf16, #tpu.memory_space<vmem>>, %arg8: memref<8x128xf32, #tpu.memory_space<vmem>>) attributes {dimension_semantics = [#tpu.dimension_semantics<parallel>], iteration_bounds = array<i64: 1>, scalar_prefetch = 0 : i64, scratch_operands = 0 : i64, tpu.core_type = #tpu.core_type<tc>, window_params = [{transform_indices = @transform_0, window_bounds = array<i64: 8, 16>}, {pipeline_mode = #tpu.pipeline_mode<synchronous>, transform_indices = @transform_1, window_bounds = array<i64: 16, 32>}, {pipeline_mode = #tpu.pipeline_mode<synchronous>, transform_indices = @transform_2, window_bounds = array<i64: 1, 32>}, {pipeline_mode = #tpu.pipeline_mode<synchronous>, transform_indices = @transform_3, window_bounds = array<i64: 32, 16>}, {pipeline_mode = #tpu.pipeline_mode<synchronous>, transform_indices = @transform_4, window_bounds = array<i64: 1, 16>}, {pipeline_mode = #tpu.pipeline_mode<synchronous>, transform_indices = @transform_5, window_bounds = array<i64: 16, 128>}, {pipeline_mode = #tpu.pipeline_mode<synchronous>, transform_indices = @transform_6, window_bounds = array<i64: 1, 128>}, {transform_indices = @transform_7, window_bounds = array<i64: 8, 128>}]} {
    %c0 = arith.constant 0 : index
    %c0_0 = arith.constant 0 : index
    %0 = vector.load %arg1[%c0, %c0_0] : memref<8x16xf32, #tpu.memory_space<vmem>>, vector<8x16xf32>
    %1 = arith.truncf %0 : vector<8x16xf32> to vector<8x16xbf16>
    %c0_1 = arith.constant 0 : index
    %c0_2 = arith.constant 0 : index
    %2 = vector.load %arg2[%c0_1, %c0_2] : memref<16x32xbf16, #tpu.memory_space<vmem>>, vector<16x32xbf16>
    %cst = arith.constant dense<0.000000e+00> : vector<8x32xf32>
    %3 = tpu.matmul %1, %2, %cst {dimension_numbers = #tpu.dot_dimension_numbers<[1], [0], [0], [1], [0, 0, 1, 1], [], []>} : vector<8x16xbf16>, vector<16x32xbf16>, vector<8x32xf32> -> vector<8x32xf32>
    %c0_3 = arith.constant 0 : index
    %c0_4 = arith.constant 0 : index
    %4 = vector.load %arg3[%c0_3, %c0_4] : memref<1x32xbf16, #tpu.memory_space<vmem>>, vector<1x32xbf16>
    %5 = arith.extf %4 : vector<1x32xbf16> to vector<1x32xf32>
    %6 = vector.broadcast %5 : vector<1x32xf32> to vector<8x32xf32>
    %7 = arith.addf %3, %6 : vector<8x32xf32>
    %cst_5 = arith.constant 0.000000e+00 : f32
    %8 = vector.broadcast %cst_5 : f32 to vector<8x32xf32>
    %9 = arith.cmpf ogt, %7, %8 : vector<8x32xf32>
    %cst_6 = arith.constant 0.00999999977 : f32
    %10 = vector.broadcast %cst_6 : f32 to vector<8x32xf32>
    %11 = arith.mulf %10, %7 : vector<8x32xf32>
    %12 = arith.select %9, %7, %11 : vector<8x32xi1>, vector<8x32xf32>
    %13 = arith.truncf %12 : vector<8x32xf32> to vector<8x32xbf16>
    %c0_7 = arith.constant 0 : index
    %c0_8 = arith.constant 0 : index
    %14 = vector.load %arg4[%c0_7, %c0_8] : memref<32x16xbf16, #tpu.memory_space<vmem>>, vector<32x16xbf16>
    %cst_9 = arith.constant dense<0.000000e+00> : vector<8x16xf32>
    %15 = tpu.matmul %13, %14, %cst_9 {dimension_numbers = #tpu.dot_dimension_numbers<[1], [0], [0], [1], [0, 0, 1, 1], [], []>} : vector<8x32xbf16>, vector<32x16xbf16>, vector<8x16xf32> -> vector<8x16xf32>
    %c0_10 = arith.constant 0 : index
    %c0_11 = arith.constant 0 : index
    %16 = vector.load %arg5[%c0_10, %c0_11] : memref<1x16xbf16, #tpu.memory_space<vmem>>, vector<1x16xbf16>
    %17 = arith.extf %16 : vector<1x16xbf16> to vector<1x16xf32>
    %18 = vector.broadcast %17 : vector<1x16xf32> to vector<8x16xf32>
    %19 = arith.addf %15, %18 : vector<8x16xf32>
    %cst_12 = arith.constant 0.000000e+00 : f32
    %20 = vector.broadcast %cst_12 : f32 to vector<8x16xf32>
    %21 = arith.cmpf ogt, %19, %20 : vector<8x16xf32>
    %cst_13 = arith.constant 0.00999999977 : f32
    %22 = vector.broadcast %cst_13 : f32 to vector<8x16xf32>
    %23 = arith.mulf %22, %19 : vector<8x16xf32>
    %24 = arith.select %21, %19, %23 : vector<8x16xi1>, vector<8x16xf32>
    %25 = arith.truncf %24 : vector<8x16xf32> to vector<8x16xbf16>
    %c0_14 = arith.constant 0 : index
    %c0_15 = arith.constant 0 : index
    %26 = vector.load %arg6[%c0_14, %c0_15] : memref<16x128xbf16, #tpu.memory_space<vmem>>, vector<16x128xbf16>
    %cst_16 = arith.constant dense<0.000000e+00> : vector<8x128xf32>
    %27 = tpu.matmul %25, %26, %cst_16 {dimension_numbers = #tpu.dot_dimension_numbers<[1], [0], [0], [1], [0, 0, 1, 1], [], []>} : vector<8x16xbf16>, vector<16x128xbf16>, vector<8x128xf32> -> vector<8x128xf32>
    %c0_17 = arith.constant 0 : index
    %c0_18 = arith.constant 0 : index
    %28 = vector.load %arg7[%c0_17, %c0_18] : memref<1x128xbf16, #tpu.memory_space<vmem>>, vector<1x128xbf16>
    %29 = arith.extf %28 : vector<1x128xbf16> to vector<1x128xf32>
    %30 = vector.broadcast %29 : vector<1x128xf32> to vector<8x128xf32>
    %31 = arith.addf %27, %30 : vector<8x128xf32>
    %32 = math.tanh %31 : vector<8x128xf32>
    %c0_19 = arith.constant 0 : index
    %c0_20 = arith.constant 0 : index
    %33 = vector.load %arg8[%c0_19, %c0_20] : memref<8x128xf32, #tpu.memory_space<vmem>>, vector<8x128xf32>
    tpu.vector_store %arg8[%c0_19, %c0_20], %32 {strides = array<i32>} : memref<8x128xf32, #tpu.memory_space<vmem>>, vector<8x128xf32>,
    return
  }
  func.func @transform_0(%arg0: i32) -> (i32, i32) {
    %c0_i32 = arith.constant 0 : i32
    %c0_i32_0 = arith.constant 0 : i32
    return %arg0, %c0_i32 : i32, i32
  }
  func.func @transform_1(%arg0: i32) -> (i32, i32) {
    %c0_i32 = arith.constant 0 : i32
    %c0_i32_0 = arith.constant 0 : i32
    %c0_i32_1 = arith.constant 0 : i32
    return %c0_i32, %c0_i32_0 : i32, i32
  }
  func.func @transform_2(%arg0: i32) -> (i32, i32) {
    %c0_i32 = arith.constant 0 : i32
    %c0_i32_0 = arith.constant 0 : i32
    %c0_i32_1 = arith.constant 0 : i32
    return %c0_i32, %c0_i32_0 : i32, i32
  }
  func.func @transform_3(%arg0: i32) -> (i32, i32) {
    %c0_i32 = arith.constant 0 : i32
    %c0_i32_0 = arith.constant 0 : i32
    %c0_i32_1 = arith.constant 0 : i32
    return %c0_i32, %c0_i32_0 : i32, i32
  }
  func.func @transform_4(%arg0: i32) -> (i32, i32) {
    %c0_i32 = arith.constant 0 : i32
    %c0_i32_0 = arith.constant 0 : i32
    %c0_i32_1 = arith.constant 0 : i32
    return %c0_i32, %c0_i32_0 : i32, i32
  }
  func.func @transform_5(%arg0: i32) -> (i32, i32) {
    %c0_i32 = arith.constant 0 : i32
    %c0_i32_0 = arith.constant 0 : i32
    %c0_i32_1 = arith.constant 0 : i32
    return %c0_i32, %c0_i32_0 : i32, i32
  }
  func.func @transform_6(%arg0: i32) -> (i32, i32) {
    %c0_i32 = arith.constant 0 : i32
    %c0_i32_0 = arith.constant 0 : i32
    %c0_i32_1 = arith.constant 0 : i32
    return %c0_i32, %c0_i32_0 : i32, i32
  }
  func.func @transform_7(%arg0: i32) -> (i32, i32) {
    %c0_i32 = arith.constant 0 : i32
    %c0_i32_0 = arith.constant 0 : i32
    return %arg0, %c0_i32 : i32, i32
  }
}

</mosaic_0001>

<bundles_post_ra>
// kernel: mu_forward.1
= control target key start
LH: loop header
LB: loop body
LE: loop exit
PB: predicated region body
PF: predicated region fallthrough
CT: control target
= control target key end

     0   :  { %v266_v0 = vmov 0.0   ;;  %vm267_vm0 = vmmov 0   ;;  %vm43_vm1 = vcmask 130048   ;;  %v33_v6 = vlaneseq  ;;  %s337_s1 = inlined_call_operand.vmem [shape: bf16[16,32], index: 1, kind: input, shape index: {}]   ;;  %s338_s0 = inlined_call_operand.vmem [shape: f32[8,16], index: 0, kind: input, shape index: {}]   ;;  %s339_s3 = inlined_call_operand.vmem [shape: bf16[32,16], index: 3, kind: input, shape index: {}]   ;;  %s340_s2 = inlined_call_operand.vmem [shape: bf16[1,32], index: 2, kind: input, shape index: {}]   ;;  %s341_s5 = inlined_call_operand.vmem [shape: bf16[16,128], index: 5, kind: input, shape index: {}]   ;;  %s342_s4 = inlined_call_operand.vmem [shape: bf16[1,16], index: 4, kind: input, shape index: {}]   ;;  %s343_s6 = inlined_call_operand.vmem [shape: bf16[1,128], index: 6, kind: input, shape index: {}]   ;;  %s344_s7 = inlined_call_operand.vmem [shape: f32[8,128], index: 7, kind: output, shape index: {}]  }
   0x1   :  { %238 = vmatprep.subr.bf16.mxu0 %v266_v0  ;;  %v260_v1 = vld [vmem:[%s337_s1] sm:$0xff]   ;;  %240 = vmatprep.mubr.msk.bf16.mxu0 %vm267_vm0, %v266_v0  ;;  %v262_v5 = vld [vmem:[%s339_s3 + $0x8] sm:$0xff]   ;;  %vm113_vm3 = vcmask 261120  }
   0x2   :  { %v27_v2 = vld [vmem:[%s338_s0] sm:$0xff]  ;;  %244 = vmatprep.subr.bf16.mxu1 %v266_v0  ;;  %248 = vmatprep.mubr.msk.bf16.mxu1 %vm267_vm0, %v266_v0  ;;  %v34_v7 = vshrl.u32 %v33_v6, 7 }
   0x3   :  { %239 = vmatpush3.bf16.msra.mxu0 %v260_v1  ;;  %v28_v3 = vpack.c.bf16 %v27_v2, %v27_v2  ;;  %v261_v4 = vld [vmem:[%s339_s3] sm:$0xff]  }
   0x4   :  { %252 = vmatprep.subr.bf16.mxu0 %v266_v0  ;;  %245 = vmatpush3.bf16.msra.mxu1 %v261_v4  ;;  %v31_v8 = vld [vmem:[%s340_s2] sm:$0x1]  ;;  %v35_v10 = vsub.s32 0, %v34_v7 }
   0x5   :  { %246 = vmatprep.subr.bf16.mxu1 %v266_v0  ;;  %v32_v9 = vunpack.c.l.bf16 %v31_v8  ;;  %v263_v20 = vld [vmem:[%s341_s5] sm:$0xff]  }
   0x6   :  { %241 = vmatmul.mubr.msk.bf16.vlgmr.msra.gmra.mrb[0].mxu0 %vm43_vm1, %v28_v3  ;;  %v95_v21 = vld [vmem:[%s342_s4] sm:$0x1] }
   0x7   :  { %254 = vmatprep.mubr.msk.bf16.mxu0 %vm267_vm0, %v266_v0  ;;  %v36_v11 = vrot.slane %v32_v9, %v35_v10  ;;  %253 = vmatpush3.bf16.msra.mxu0 %v263_v20  ;;  %v96_v22 = vunpack.c.l.bf16 %v95_v21  ;;  %v163_v32 = vld [vmem:[%s343_s6] sm:$0x1] }
   0x8   :  { %247 = vmatpush3.bf16.msra.mxu1 %v262_v5  ;;  %v164_v33 = vunpack.c.l.bf16 %v163_v32 }
   0x9   :  { %v100_v23 = vrot.slane %v96_v22, %v35_v10 }
   0xa   :  { %v168_v34 = vrot.slane %v164_v33, %v35_v10 }
  0xd9   :  { %v81_v12 = vpop.f32.mrb[0].mxu0 }
  0xda   :  { %v82_v13 = vadd.f32 %v81_v12, %v36_v11  ;;  %v242_v14 = vpop.f32.mrb[1].mxu0 }
  0xdb   :  { %v84_v15 = vpop.f32.mrb[2].mxu0 }
  0xdc   :  { %vm87_vm2 = vcmp.gt.f32.partialorder %v82_v13, 0.0  ;;  %v88_v16 = vmul.f32 0.01, %v82_v13  ;;  %v243_v17 = vpop.f32.mrb[3].mxu0 }
  0xde   :  { %v89_v18 = vsel %vm87_vm2, %v82_v13, %v88_v16 }
  0xdf   :  { %v90_v19 = vpack.c.bf16 %v89_v18, %v89_v18 }
  0xe1   :  { %249 = vmatmul.mubr.msk.bf16.vlgmr.msra.gmra.mrb[0].mxu1 %vm113_vm3, %v90_v19 }
 0x1b4   :  { %v151_v24 = vpop.f32.mrb[0].mxu1 }
 0x1b5   :  { %v152_v25 = vadd.f32 %v151_v24, %v100_v23  ;;  %v250_v26 = vpop.f32.mrb[1].mxu1 }
 0x1b6   :  { %v154_v27 = vpop.f32.mrb[2].mxu1 }
 0x1b7   :  { %vm157_vm4 = vcmp.gt.f32.partialorder %v152_v25, 0.0  ;;  %v158_v28 = vmul.f32 0.01, %v152_v25  ;;  %v251_v29 = vpop.f32.mrb[3].mxu1 }
 0x1b9   :  { %v159_v30 = vsel %vm157_vm4, %v152_v25, %v158_v28 }
 0x1ba   :  { %v160_v31 = vpack.c.bf16 %v159_v30, %v159_v30 }
 0x1bc   :  { %255 = vmatmul.mubr.msk.bf16.vlgmr.msra.gmra.mrb[4].mxu0 %vm43_vm1, %v160_v31 }
 0x28f   :  { %v212_v35 = vpop.f32.mrb[4].mxu0 }
 0x290   :  { %v213_v36 = vadd.f32 %v212_v35, %v168_v34  ;;  %v256_v37 = vpop.f32.mrb[5].mxu0 }
 0x291   :  { %v215_v38 = vpop.f32.mrb[6].mxu0 }
 0x292   :  { %264 = vtanh.f32 %v213_v36  ;;  %v257_v39 = vpop.f32.mrb[7].mxu0 }
 0x29c   :  { %v265_v40 = vpop.eup %264 }
 0x29d   :  { %219 = vst [vmem:[%s344_s7] sm:$0xff] %v265_v40 }

</bundles_post_ra>
